<compile_context>
chip_gen: v5e
topology: v5e:2x2
jax: 0.10.0
libtpu: 0.0.40
codegen_flags: <defaults>
</compile_context>

<pallas_src>
import functools
import math

import jax
import jax.numpy as jnp
from jax import lax
from jax.experimental import pallas as pl
from jax.experimental.pallas import tpu as pltpu


def _vmem_capacity_bytes(default_bytes=64 * 1024 * 1024):
    """Per-core VMEM capacity for the current backend (falls back to 64 MiB)."""
    try:
        return int(pltpu.get_tpu_info().vmem_capacity_bytes)
    except Exception:  # older jax / non-TPU tracing: assume v7x-sized (smallest)
        return default_bytes


def _pick_tq(S, H, vmem_cap, mm_itemsize, max_tq=512):
    """Largest query tile that divides S, is a multiple of 8 and fits VMEM."""
    # Residents: x block (f32, single-buffered) + K scratch + weights + the
    # transient full-seq projection temporaries at qi == 0.
    fixed = (4 + mm_itemsize + 8) * S * H + 8 * H * H
    budget = int(0.6 * vmem_cap) - fixed
    # Per query row: double-buffered out/attn tiles + ~8 (tq,S) f32 softmax
    # temporaries (scores, iota, mask, exp, p, bf16 copy, ...) + (tq,H) temps.
    per_row = 24 * H + 40 * S
    cap = min(max(budget // per_row, 8), max_tq)
    if S <= cap:
        return S
    best, t = 0, 8
    while t <= cap:
        if S % t == 0:
            best = t
        t += 8
    if best:
        return best
    # TODO(synk): padded / partial-tile path for S with no multiple-of-8 divisor
    # <= cap; falling back to a whole-S tile can exceed VMEM for very large S.
    return S


def _mul_attention_kernel(kmul_ref, x_ref, wk_ref, bk_ref, wq_ref, bq_ref,
                          out_ref, attn_ref, k_scratch,
                          *, tq, inv_sqrt_dk, mm_dtype):
    b = pl.program_id(0)       # batch index        ("parallel" -> megacore)
    qi = pl.program_id(1)      # query-tile index   ("arbitrary" -> sequential)
    S = x_ref.shape[1]
    H = x_ref.shape[2]

    # ---- K projection: once per batch, persisted in VMEM scratch ------------
    @pl.when(qi == 0)
    def _():
        xr = jnp.maximum(x_ref[0], 0.0)                          # (S, H) shared ReLU
        k_f32 = jnp.dot(xr.astype(mm_dtype), wk_ref[...].astype(mm_dtype),
                        preferred_element_type=jnp.float32) + bk_ref[0]
        k_scratch[...] = k_f32.astype(k_scratch.dtype)

    k = k_scratch[...]                                           # (S, H); value == key

    # ---- batches b != 0: mask is all zeros -> softmax is exactly uniform ----
    @pl.when(b != 0)
    def _():
        attn_ref[0] = jnp.full((tq, S), 1.0 / S, dtype=jnp.float32)
        mean_k = jnp.sum(k.astype(jnp.float32), axis=0, keepdims=True) * (1.0 / S)
        out_ref[0] = jnp.broadcast_to(mean_k, (tq, H)).astype(out_ref.dtype)

    # ---- batch 0: banded-mask attention over this query tile ----------------
    @pl.when(b == 0)
    def _():
        start = pl.multiple_of(qi * tq, 8)
        xq = jnp.maximum(x_ref[0, pl.ds(start, tq), :], 0.0)     # (tq, H)
        # Fold 1/sqrt(d_k) into q (O(tq*H)) instead of into the (tq,S) scores.
        q_t = (jnp.dot(xq.astype(mm_dtype), wq_ref[...].astype(mm_dtype),
                       preferred_element_type=jnp.float32)
               + bq_ref[0]) * inv_sqrt_dk
        # scores = q_t @ k^T, contracting dim 1 of both (no k relayout).
        scores = lax.dot_general(q_t.astype(mm_dtype), k,
                                 (((1,), (1,)), ((), ())),
                                 preferred_element_type=jnp.float32)   # (tq, S)

        # Banded mask 0 <= row - col <= k_mul, fused into one unsigned compare.
        km = kmul_ref[0]
        d = (lax.broadcasted_iota(jnp.int32, (tq, S), 0) + qi * tq
             - lax.broadcasted_iota(jnp.int32, (tq, S), 1))
        keep = d.astype(jnp.uint32) <= km.astype(jnp.uint32)
        scores = jnp.where(keep, scores, -1e9)

        # Numerically stable softmax; exact normalize so attn rows sum to 1.
        m = jnp.max(scores, axis=-1, keepdims=True)
        e = jnp.exp(scores - m)
        p = e / jnp.sum(e, axis=-1, keepdims=True)
        attn_ref[0] = p
        out_ref[0] = jnp.dot(p.astype(mm_dtype), k,
                             preferred_element_type=jnp.float32).astype(out_ref.dtype)


def mul_attention(x, w_key, b_key, w_q, b_q, k_mul, *, use_bf16_matmul=True):
    """x: (B, S, H) float32. w_*: (H, H) in PyTorch (out, in) layout. b_*: (H,)."""
    B, S, H = x.shape
    mm_dtype = jnp.bfloat16 if use_bf16_matmul else jnp.float32
    mm_itemsize = 2 if use_bf16_matmul else 4

    vmem_cap = _vmem_capacity_bytes()
    tq = _pick_tq(S, H, vmem_cap, mm_itemsize)
    assert S % tq == 0
    n_q = S // tq
    # Generation-aware scoped-VMEM limit (~100 MiB on 128-MiB parts, ~50 MiB v7x).
    vmem_limit = int(vmem_cap * 0.78)

    wk_t = jnp.asarray(w_key, jnp.float32).T        # (H, H): relu(x) @ Wk^T
    wq_t = jnp.asarray(w_q, jnp.float32).T
    bk = jnp.asarray(b_key, jnp.float32).reshape(1, H)
    bq = jnp.asarray(b_q, jnp.float32).reshape(1, H)
    kmul_arr = jnp.asarray([k_mul], jnp.int32)      # scalar-prefetch -> SMEM

    kernel = functools.partial(_mul_attention_kernel, tq=tq,
                               inv_sqrt_dk=1.0 / math.sqrt(H), mm_dtype=mm_dtype)

    # TODO(synk): for B == 1 on v7x, split the K projection into its own
    # parallel pallas_call so both TensorCores stay busy; for very large S*H
    # stream K through an inner pltpu.emit_pipeline instead of a full (S, H)
    # scratch.
    out, attn = pl.pallas_call(
        kernel,
        out_shape=(jax.ShapeDtypeStruct((B, S, H), jnp.float32),
                   jax.ShapeDtypeStruct((B, S, S), jnp.float32)),
        grid_spec=pltpu.PrefetchScalarGridSpec(
            num_scalar_prefetch=1,
            grid=(B, n_q),
            in_specs=[
                # x: full sequence (needed for keys); invariant across qi.
                pl.BlockSpec((1, S, H), lambda b, q, km: (b, 0, 0),
                             pipeline_mode=pl.Buffered(1)),
                pl.BlockSpec((H, H), lambda b, q, km: (0, 0),      # Wk^T
                             pipeline_mode=pl.Buffered(1)),
                pl.BlockSpec((1, H), lambda b, q, km: (0, 0),      # bk
                             pipeline_mode=pl.Buffered(1)),
                pl.BlockSpec((H, H), lambda b, q, km: (0, 0),      # Wq^T
                             pipeline_mode=pl.Buffered(1)),
                pl.BlockSpec((1, H), lambda b, q, km: (0, 0),      # bq
                             pipeline_mode=pl.Buffered(1)),
            ],
            out_specs=[
                pl.BlockSpec((1, tq, H), lambda b, q, km: (b, q, 0)),  # out tile
                pl.BlockSpec((1, tq, S), lambda b, q, km: (b, q, 0)),  # attn tile
            ],
            scratch_shapes=[pltpu.VMEM((S, H), mm_dtype)],             # per-batch K
        ),
        compiler_params=pltpu.CompilerParams(
            dimension_semantics=("parallel", "arbitrary"),
            vmem_limit_bytes=vmem_limit),
    )(kmul_arr, x, wk_t, bk, wq_t, bq)
    return out, attn


def _reference(x, w_key, b_key, w_q, b_q, k_mul):
    """Pure-JAX (float32) reference mirroring the PyTorch forward."""
    B, S, H = x.shape
    xr = jnp.maximum(x, 0.0)
    k = xr @ w_key.T + b_key
    q = xr @ w_q.T + b_q
    i = jnp.arange(S)[:, None]
    j = jnp.arange(S)[None, :]
    band = ((j <= i) & (j >= i - k_mul)).astype(jnp.float32)
    mask = jnp.zeros((B, S, S), jnp.float32).at[0].set(band)
    scores = (q @ jnp.swapaxes(k, -2, -1)) / math.sqrt(H)
    scores = jnp.where(mask == 0, -1e9, scores)
    p = jax.nn.softmax(scores, axis=-1)
    return p @ k, p


if __name__ == "__main__":
    B, S, H = 2, 8, 32
    k_mul = 2

    key = jax.random.PRNGKey(0)
    kx, kwk, kbk, kwq, kbq = jax.random.split(key, 5)

    x = jax.random.normal(kx, (B, S, H), dtype=jnp.float32)
    # nn.Linear-style init (uniform in +/- 1/sqrt(H)), PyTorch (out, in) layout.
    bound = 1.0 / math.sqrt(H)
    w_key = jax.random.uniform(kwk, (H, H), jnp.float32, -bound, bound)
    b_key = jax.random.uniform(kbk, (H,), jnp.float32, -bound, bound)
    w_q = jax.random.uniform(kwq, (H, H), jnp.float32, -bound, bound)
    b_q = jax.random.uniform(kbq, (H,), jnp.float32, -bound, bound)

    out, attn = mul_attention(x, w_key, b_key, w_q, b_q, k_mul)
    out = jax.block_until_ready(out)
    attn = jax.block_until_ready(attn)

    ref_out, ref_attn = _reference(x, w_key, b_key, w_q, b_q, k_mul)
    assert out.shape == (B, S, H) and attn.shape == (B, S, S)
    # Tolerance relaxed for the bf16-operand / f32-accumulate MXU matmuls
    # (precision trade requested by the perf review).
    assert jnp.allclose(out, ref_out, atol=2e-2, rtol=2e-2)
    assert jnp.allclose(attn, ref_attn, atol=2e-2, rtol=2e-2)

    print("KERNEL_OK")
</pallas_src>

<mosaic_0001>
module attributes {stable_mosaic.version = 11 : i64} {
  func.func @_mul_attention_kernel(%arg0: i32, %arg1: i32, %arg2: memref<1xi32, #tpu.memory_space<smem>>, %arg3: memref<1x8x32xf32, #tpu.memory_space<vmem>>, %arg4: memref<32x32xf32, #tpu.memory_space<vmem>>, %arg5: memref<1x32xf32, #tpu.memory_space<vmem>>, %arg6: memref<32x32xf32, #tpu.memory_space<vmem>>, %arg7: memref<1x32xf32, #tpu.memory_space<vmem>>, %arg8: memref<1x8x32xf32, #tpu.memory_space<vmem>>, %arg9: memref<1x8x8xf32, #tpu.memory_space<vmem>>, %arg10: memref<8x32xbf16, #tpu.memory_space<vmem>>) attributes {dimension_semantics = [#tpu.dimension_semantics<parallel>, #tpu.dimension_semantics<arbitrary>], iteration_bounds = array<i64: 2, 1>, scalar_prefetch = 1 : i64, scratch_operands = 1 : i64, tpu.core_type = #tpu.core_type<tc>, window_params = [{pipeline_mode = #tpu.pipeline_mode<synchronous>, transform_indices = @transform_0, window_bounds = array<i64: 1, 8, 32>}, {pipeline_mode = #tpu.pipeline_mode<synchronous>, transform_indices = @transform_1, window_bounds = array<i64: 32, 32>}, {pipeline_mode = #tpu.pipeline_mode<synchronous>, transform_indices = @transform_2, window_bounds = array<i64: 1, 32>}, {pipeline_mode = #tpu.pipeline_mode<synchronous>, transform_indices = @transform_3, window_bounds = array<i64: 32, 32>}, {pipeline_mode = #tpu.pipeline_mode<synchronous>, transform_indices = @transform_4, window_bounds = array<i64: 1, 32>}, {transform_indices = @transform_5, window_bounds = array<i64: 1, 8, 32>}, {transform_indices = @transform_6, window_bounds = array<i64: 1, 8, 8>}]} {
    %c0_i32 = arith.constant 0 : i32
    %0 = arith.cmpi eq, %arg1, %c0_i32 : i32
    %1 = arith.extui %0 : i1 to i32
    %c0_i32_0 = arith.constant 0 : i32
    %2 = arith.cmpi ne, %1, %c0_i32_0 : i32
    scf.if %2 {
      %c0_6 = arith.constant 0 : index
      %c0_7 = arith.constant 0 : index
      %c0_8 = arith.constant 0 : index
      %10 = vector.load %arg3[%c0_6, %c0_7, %c0_8] : memref<1x8x32xf32, #tpu.memory_space<vmem>>, vector<1x8x32xf32>
      %11 = vector.shape_cast %10 : vector<1x8x32xf32> to vector<8x32xf32>
      %cst = arith.constant 0.000000e+00 : f32
      %12 = vector.broadcast %cst : f32 to vector<8x32xf32>
      %13 = arith.maximumf %11, %12 : vector<8x32xf32>
      %14 = arith.truncf %13 : vector<8x32xf32> to vector<8x32xbf16>
      %c0_9 = arith.constant 0 : index
      %c0_10 = arith.constant 0 : index
      %15 = vector.load %arg4[%c0_9, %c0_10] : memref<32x32xf32, #tpu.memory_space<vmem>>, vector<32x32xf32>
      %16 = arith.truncf %15 : vector<32x32xf32> to vector<32x32xbf16>
      %cst_11 = arith.constant dense<0.000000e+00> : vector<8x32xf32>
      %17 = tpu.matmul %14, %16, %cst_11 {dimension_numbers = #tpu.dot_dimension_numbers<[1], [0], [0], [1], [0, 0, 1, 1], [], []>} : vector<8x32xbf16>, vector<32x32xbf16>, vector<8x32xf32> -> vector<8x32xf32>
      %c0_12 = arith.constant 0 : index
      %c0_13 = arith.constant 0 : index
      %18 = vector.load %arg5[%c0_12, %c0_13] : memref<1x32xf32, #tpu.memory_space<vmem>>, vector<1x32xf32>
      %19 = vector.shape_cast %18 : vector<1x32xf32> to vector<32xf32>
      %20 = vector.shape_cast %19 : vector<32xf32> to vector<1x32xf32>
      %21 = vector.broadcast %20 : vector<1x32xf32> to vector<8x32xf32>
      %22 = arith.addf %17, %21 : vector<8x32xf32>
      %23 = arith.truncf %22 : vector<8x32xf32> to vector<8x32xbf16>
      %c0_14 = arith.constant 0 : index
      %c0_15 = arith.constant 0 : index
      %24 = vector.load %arg10[%c0_14, %c0_15] : memref<8x32xbf16, #tpu.memory_space<vmem>>, vector<8x32xbf16>
      tpu.vector_store %arg10[%c0_14, %c0_15], %23 {strides = array<i32>} : memref<8x32xbf16, #tpu.memory_space<vmem>>, vector<8x32xbf16>,
    } else {
    }
    %c0 = arith.constant 0 : index
    %c0_1 = arith.constant 0 : index
    %3 = vector.load %arg10[%c0, %c0_1] : memref<8x32xbf16, #tpu.memory_space<vmem>>, vector<8x32xbf16>
    %c0_i32_2 = arith.constant 0 : i32
    %4 = arith.cmpi ne, %arg0, %c0_i32_2 : i32
    %5 = arith.extui %4 : i1 to i32
    %c0_i32_3 = arith.constant 0 : i32
    %6 = arith.cmpi ne, %5, %c0_i32_3 : i32
    scf.if %6 {
      %cst = arith.constant 1.250000e-01 : f32
      %10 = vector.broadcast %cst : f32 to vector<8x8xf32>
      %c0_6 = arith.constant 0 : index
      %c0_7 = arith.constant 0 : index
      %c0_8 = arith.constant 0 : index
      %11 = vector.load %arg9[%c0_6, %c0_7, %c0_8] : memref<1x8x8xf32, #tpu.memory_space<vmem>>, vector<1x8x8xf32>
      %12 = vector.shape_cast %11 : vector<1x8x8xf32> to vector<8x8xf32>
      %13 = vector.shape_cast %10 : vector<8x8xf32> to vector<1x8x8xf32>
      tpu.vector_store %arg9[%c0_6, %c0_7, %c0_8], %13 {strides = array<i32>} : memref<1x8x8xf32, #tpu.memory_space<vmem>>, vector<1x8x8xf32>,
      %14 = arith.extf %3 : vector<8x32xbf16> to vector<8x32xf32>
      %cst_9 = arith.constant dense<0.000000e+00> : vector<32xf32>
      %15 = vector.multi_reduction <add>, %14, %cst_9 [0] : vector<8x32xf32> to vector<32xf32>
      %16 = vector.shape_cast %15 : vector<32xf32> to vector<1x32xf32>
      %cst_10 = arith.constant 1.250000e-01 : f32
      %17 = vector.broadcast %cst_10 : f32 to vector<1x32xf32>
      %18 = arith.mulf %16, %17 : vector<1x32xf32>
      %19 = vector.shape_cast %18 : vector<1x32xf32> to vector<1x32xf32>
      %20 = vector.broadcast %19 : vector<1x32xf32> to vector<8x32xf32>
      %c0_11 = arith.constant 0 : index
      %c0_12 = arith.constant 0 : index
      %c0_13 = arith.constant 0 : index
      %21 = vector.load %arg8[%c0_11, %c0_12, %c0_13] : memref<1x8x32xf32, #tpu.memory_space<vmem>>, vector<1x8x32xf32>
      %22 = vector.shape_cast %21 : vector<1x8x32xf32> to vector<8x32xf32>
      %23 = vector.shape_cast %20 : vector<8x32xf32> to vector<1x8x32xf32>
      tpu.vector_store %arg8[%c0_11, %c0_12, %c0_13], %23 {strides = array<i32>} : memref<1x8x32xf32, #tpu.memory_space<vmem>>, vector<1x8x32xf32>,
    } else {
    }
    %c0_i32_4 = arith.constant 0 : i32
    %7 = arith.cmpi eq, %arg0, %c0_i32_4 : i32
    %8 = arith.extui %7 : i1 to i32
    %c0_i32_5 = arith.constant 0 : i32
    %9 = arith.cmpi ne, %8, %c0_i32_5 : i32
    scf.if %9 {
      %c8_i32 = arith.constant 8 : i32
      %10 = arith.muli %arg1, %c8_i32 : i32
      %11 = tpu.assume_multiple %10, 8 : i32
      %c0_6 = arith.constant 0 : index
      %12 = arith.index_cast %11 : i32 to index
      %c0_7 = arith.constant 0 : index
      %13 = vector.load %arg3[%c0_6, %12, %c0_7] : memref<1x8x32xf32, #tpu.memory_space<vmem>>, vector<1x8x32xf32>
      %14 = vector.shape_cast %13 : vector<1x8x32xf32> to vector<8x32xf32>
      %cst = arith.constant 0.000000e+00 : f32
      %15 = vector.broadcast %cst : f32 to vector<8x32xf32>
      %16 = arith.maximumf %14, %15 : vector<8x32xf32>
      %17 = arith.truncf %16 : vector<8x32xf32> to vector<8x32xbf16>
      %c0_8 = arith.constant 0 : index
      %c0_9 = arith.constant 0 : index
      %18 = vector.load %arg6[%c0_8, %c0_9] : memref<32x32xf32, #tpu.memory_space<vmem>>, vector<32x32xf32>
      %19 = arith.truncf %18 : vector<32x32xf32> to vector<32x32xbf16>
      %cst_10 = arith.constant dense<0.000000e+00> : vector<8x32xf32>
      %20 = tpu.matmul %17, %19, %cst_10 {dimension_numbers = #tpu.dot_dimension_numbers<[1], [0], [0], [1], [0, 0, 1, 1], [], []>} : vector<8x32xbf16>, vector<32x32xbf16>, vector<8x32xf32> -> vector<8x32xf32>
      %c0_11 = arith.constant 0 : index
      %c0_12 = arith.constant 0 : index
      %21 = vector.load %arg7[%c0_11, %c0_12] : memref<1x32xf32, #tpu.memory_space<vmem>>, vector<1x32xf32>
      %22 = vector.shape_cast %21 : vector<1x32xf32> to vector<32xf32>
      %23 = vector.shape_cast %22 : vector<32xf32> to vector<1x32xf32>
      %24 = vector.broadcast %23 : vector<1x32xf32> to vector<8x32xf32>
      %25 = arith.addf %20, %24 : vector<8x32xf32>
      %cst_13 = arith.constant 0.176776692 : f32
      %26 = vector.broadcast %cst_13 : f32 to vector<8x32xf32>
      %27 = arith.mulf %25, %26 : vector<8x32xf32>
      %28 = arith.truncf %27 : vector<8x32xf32> to vector<8x32xbf16>
      %cst_14 = arith.constant dense<0.000000e+00> : vector<8x8xf32>
      %29 = tpu.matmul %28, %3, %cst_14 {dimension_numbers = #tpu.dot_dimension_numbers<[1], [1], [0], [0], [0, 0, 1, 0], [], []>} : vector<8x32xbf16>, vector<8x32xbf16>, vector<8x8xf32> -> vector<8x8xf32>
      %c0_15 = arith.constant 0 : index
      %30 = memref.load %arg2[%c0_15] : memref<1xi32, #tpu.memory_space<smem>>
      %31 = tpu.iota {dimensions = array<i32: 0>} : vector<8x8xi32>
      %c8_i32_16 = arith.constant 8 : i32
      %32 = arith.muli %arg1, %c8_i32_16 : i32
      %33 = vector.broadcast %32 : i32 to vector<8x8xi32>
      %34 = arith.addi %31, %33 : vector<8x8xi32>
      %35 = tpu.iota {dimensions = array<i32: 1>} : vector<8x8xi32>
      %36 = arith.subi %34, %35 : vector<8x8xi32>
      %37 = vector.broadcast %30 : i32 to vector<8x8xi32>
      %38 = arith.cmpi ule, %36, %37 : vector<8x8xi32>
      %cst_17 = arith.constant -1.000000e+09 : f32
      %39 = vector.broadcast %cst_17 : f32 to vector<8x8xf32>
      %40 = arith.select %38, %29, %39 : vector<8x8xi1>, vector<8x8xf32>
      %cst_18 = arith.constant dense<0xFF800000> : vector<8xf32>
      %41 = vector.multi_reduction <maximumf>, %40, %cst_18 [1] : vector<8x8xf32> to vector<8xf32>
      %42 = vector.shape_cast %41 : vector<8xf32> to vector<8x1xf32>
      %43 = vector.broadcast %42 : vector<8x1xf32> to vector<8x8xf32>
      %44 = arith.subf %40, %43 : vector<8x8xf32>
      %45 = math.exp %44 : vector<8x8xf32>
      %cst_19 = arith.constant dense<0.000000e+00> : vector<8xf32>
      %46 = vector.multi_reduction <add>, %45, %cst_19 [1] : vector<8x8xf32> to vector<8xf32>
      %47 = vector.shape_cast %46 : vector<8xf32> to vector<8x1xf32>
      %48 = vector.broadcast %47 : vector<8x1xf32> to vector<8x8xf32>
      %49 = arith.divf %45, %48 : vector<8x8xf32>
      %c0_20 = arith.constant 0 : index
      %c0_21 = arith.constant 0 : index
      %c0_22 = arith.constant 0 : index
      %50 = vector.load %arg9[%c0_20, %c0_21, %c0_22] : memref<1x8x8xf32, #tpu.memory_space<vmem>>, vector<1x8x8xf32>
      %51 = vector.shape_cast %50 : vector<1x8x8xf32> to vector<8x8xf32>
      %52 = vector.shape_cast %49 : vector<8x8xf32> to vector<1x8x8xf32>
      tpu.vector_store %arg9[%c0_20, %c0_21, %c0_22], %52 {strides = array<i32>} : memref<1x8x8xf32, #tpu.memory_space<vmem>>, vector<1x8x8xf32>,
      %53 = arith.truncf %49 : vector<8x8xf32> to vector<8x8xbf16>
      %cst_23 = arith.constant dense<0.000000e+00> : vector<8x32xf32>
      %54 = tpu.matmul %53, %3, %cst_23 {dimension_numbers = #tpu.dot_dimension_numbers<[1], [0], [0], [1], [0, 0, 1, 1], [], []>} : vector<8x8xbf16>, vector<8x32xbf16>, vector<8x32xf32> -> vector<8x32xf32>
      %c0_24 = arith.constant 0 : index
      %c0_25 = arith.constant 0 : index
      %c0_26 = arith.constant 0 : index
      %55 = vector.load %arg8[%c0_24, %c0_25, %c0_26] : memref<1x8x32xf32, #tpu.memory_space<vmem>>, vector<1x8x32xf32>
      %56 = vector.shape_cast %55 : vector<1x8x32xf32> to vector<8x32xf32>
      %57 = vector.shape_cast %54 : vector<8x32xf32> to vector<1x8x32xf32>
      tpu.vector_store %arg8[%c0_24, %c0_25, %c0_26], %57 {strides = array<i32>} : memref<1x8x32xf32, #tpu.memory_space<vmem>>, vector<1x8x32xf32>,
    } else {
    }
    return
  }
  func.func @transform_0(%arg0: i32, %arg1: i32, %arg2: memref<1xi32, #tpu.memory_space<smem>>) -> (i32, i32, i32) {
    %c0_i32 = arith.constant 0 : i32
    %c0_i32_0 = arith.constant 0 : i32
    %c0_i32_1 = arith.constant 0 : i32
    return %arg0, %c0_i32, %c0_i32_0 : i32, i32, i32
  }
  func.func @transform_1(%arg0: i32, %arg1: i32, %arg2: memref<1xi32, #tpu.memory_space<smem>>) -> (i32, i32) {
    %c0_i32 = arith.constant 0 : i32
    %c0_i32_0 = arith.constant 0 : i32
    %c0_i32_1 = arith.constant 0 : i32
    return %c0_i32, %c0_i32_0 : i32, i32
  }
  func.func @transform_2(%arg0: i32, %arg1: i32, %arg2: memref<1xi32, #tpu.memory_space<smem>>) -> (i32, i32) {
    %c0_i32 = arith.constant 0 : i32
    %c0_i32_0 = arith.constant 0 : i32
    %c0_i32_1 = arith.constant 0 : i32
    return %c0_i32, %c0_i32_0 : i32, i32
  }
  func.func @transform_3(%arg0: i32, %arg1: i32, %arg2: memref<1xi32, #tpu.memory_space<smem>>) -> (i32, i32) {
    %c0_i32 = arith.constant 0 : i32
    %c0_i32_0 = arith.constant 0 : i32
    %c0_i32_1 = arith.constant 0 : i32
    return %c0_i32, %c0_i32_0 : i32, i32
  }
  func.func @transform_4(%arg0: i32, %arg1: i32, %arg2: memref<1xi32, #tpu.memory_space<smem>>) -> (i32, i32) {
    %c0_i32 = arith.constant 0 : i32
    %c0_i32_0 = arith.constant 0 : i32
    %c0_i32_1 = arith.constant 0 : i32
    return %c0_i32, %c0_i32_0 : i32, i32
  }
  func.func @transform_5(%arg0: i32, %arg1: i32, %arg2: memref<1xi32, #tpu.memory_space<smem>>) -> (i32, i32, i32) {
    %c0_i32 = arith.constant 0 : i32
    %c0_i32_0 = arith.constant 0 : i32
    return %arg0, %arg1, %c0_i32 : i32, i32, i32
  }
  func.func @transform_6(%arg0: i32, %arg1: i32, %arg2: memref<1xi32, #tpu.memory_space<smem>>) -> (i32, i32, i32) {
    %c0_i32 = arith.constant 0 : i32
    %c0_i32_0 = arith.constant 0 : i32
    return %arg0, %arg1, %c0_i32 : i32, i32, i32
  }
}

</mosaic_0001>

<bundles_post_ra>
// kernel: tpu_custom_call.1
= control target key start
LH: loop header
LB: loop body
LE: loop exit
PB: predicated region body
PF: predicated region fallthrough
CT: control target
= control target key end

     0   :  { %s1251_s0 = inlined_call_operand.<no memory space> [shape: s32[1], index: 0, kind: input, shape index: {}]   ;;  %s1252_s1 = inlined_call_operand.hbm [shape: f32[2,8,32], index: 1, kind: input, shape index: {}]   ;;  %s1253_s2 = inlined_call_operand.hbm [shape: f32[32,32], index: 2, kind: input, shape index: {}]   ;;  %s1254_s3 = inlined_call_operand.vmem [shape: f32[1,32], index: 3, kind: input, shape index: {}]   ;;  %s1255_s4 = inlined_call_operand.hbm [shape: f32[32,32], index: 4, kind: input, shape index: {}]   ;;  %s1256_s5 = inlined_call_operand.vmem [shape: f32[1,32], index: 5, kind: input, shape index: {}]   ;;  %s1257_s6 = inlined_call_operand.hbm [shape: f32[2,8,32], index: 6, kind: output, shape index: {0}]   ;;  %s1258_s7 = inlined_call_operand.hbm [shape: f32[2,8,8], index: 7, kind: output, shape index: {1}]  }
   0x1   :  { %1265 = sst [smem:[#allocation23_spill]] %s1253_s2 }
   0x2   :  { %13 = sst [smem:[#allocation4]] %s1251_s0 }
   0x3   :  { %14 = vsyncpa [#allocation6], 0 }
   0x4   :  { %15 = vsyncpa [#allocation9], 0 }
   0x5   :  { %16 = vsyncpa [#allocation7], 0 }
   0x6   :  { %18 = vsyncpa [#allocation7 + $0x1], 0 }
   0x7   :  { %19 = vsyncpa [#allocation13], 0 }
   0x8   :  { %21 = vsyncpa [#allocation13 + $0x1], 0  ;;  %s1029_s26 = smov 0   ;;  %s1031_s27 = smov 0  }
   0x9   :  { %s1033_s28 = smov 0   ;;  %s1035_s29 = smov 0  }
   0xa   :  { %s1037_s30 = smov 0   ;;  %s1039_s8 = smov 0  }
   0xb LB: > { %1266 = sst [smem:[#allocation18_spill]] %s966_s28  ;;  %s649_s11 = sadd.s32 4294967295, %s978_s8   ;;  %s978_s8 = sphi %s1039_s8, %s27_s8   ;;  %s974_s30 = sphi %s1037_s30, %s1286_s30   ;;  %s970_s29 = sphi %s1035_s29, %s1285_s29   ;;  %s966_s28 = sphi %s1033_s28, %s1284_s28   ;;  %s962_s27 = sphi %s1031_s27, %s1288_s27   ;;  %s958_s26 = sphi %s1029_s26, %s1287_s26  }
   0xc   : > { %1267 = sst [smem:[#allocation19_spill]] %s974_s30  ;;  %p651_p0 = scmp.ge.s32.totalorder %s978_s8, 1 }
   0xd   : > { %s1268_s2 = sld [smem:[#allocation23_spill]]  ;;  %p1064_p1 = scmp.eq.s32.totalorder %s649_s11, 0 }
   0xe   : > { %p210_p2 = scmp.lt.s32.totalorder %s978_s8, 3  ;;  %s980_s14 = smov [#allocation8]  }
   0xf   : > { %s237_s15 = sshll.u32 %s980_s14, 4  ;;  %s1259_s17 = smov 128   ;;  %s238_s15 = int_to_ptr.vmem [resolvable:$true] %s237_s15 }
  0x10   : > { %p1069_p3 = pnand %p651_p0, %p210_p2  ;;  %s1260_s18 = smov 8  }
  0x11   : > { %s650_s19 = sadd.s32 4294967294, %s978_s8   ;;  %s39_s20 = sadd.s32 1, %s974_s30 }
  0x12   : > { %p688_p4 = pneg %p1069_p3  ;;  %p41_p6 = scmp.ge.s32.totalorder %s39_s20, 2 }
  0x13   : > { %s235_s10 = sshll.u32 %s1268_s2, 4  ;;  %s46_s21 = sadd.s32 1, %s966_s28  ;;  %s236_s10 = int_to_ptr.hbm [resolvable:$true] %s235_s10 }
  0x14   : > { %p1080_p5 = pnand %p688_p4, %p1064_p1  ;;  %p59_p7 = scmp.ne.s32.totalorder %s962_s27, %s958_s26 }
  0x15   : > { %p168_p8 = scmp.ne.s32.totalorder %s966_s28, %s962_s27  ;;  %s1290_s20 = smov (%p41_p6, %s39_s20), 0 }
  0x16   : > { %694 = dma.hbm_to_vmem [thread:$0]  (!%p1080_p5), %s236_s10, 512, %s238_s15, [#allocation9], %s1259_s17, %s1259_s17, %s1260_s18  }
  0x17   : > { %1272 = sst [smem:[#allocation20_spill]] %s1290_s20  ;;  %p1100_p9 = por %p1064_p1, %p59_p7 }
  0x18   : > { %p169_p10 = scmp.eq.s32.totalorder %s649_s11, 1  ;;  %s43_s23 = ssub.s32 %s974_s30, %s1290_s20 }
  0x19   : > { %p175_p11 = scmp.eq.s32.totalorder %s650_s19, 1  ;;  %p44_p12 = scmp.eq.s32.totalorder %s43_s23, 0 }
  0x1a   : > { %p1106_p13 = por %p169_p10, %p168_p8  ;;  %s1115_s0 = sshll.u32 %s970_s29, 3 }
  0x1b   : > { %p1110_p0 = por %p175_p11, %p59_p7  ;;  %s222_s11 = scalar_lea.hbm %s1252_s1, %s1115_s0 }
  0x1c   : > { %s1118_s9 = scalar_select %p44_p12, %s966_s28, %s46_s21  }
  0x1d   : > { %s1275_s25 = scalar_select %p1110_p0, 1, 0 }
  0x1e   : > { %1277 = sst [smem:[#allocation22_spill]] %s1118_s9  ;;  %s224_s15 = sshll.u32 %s222_s11, 4  ;;  %s225_s15 = int_to_ptr.hbm [resolvable:$true] %s224_s15 }
  0x1f   : > { %1276 = sst [smem:[#allocation21_spill]] %s1275_s25  ;;  %s983_s19 = smov [#allocation5]  }
  0x20   : > { %s226_s23 = sshll.u32 %s983_s19, 4  ;;  %p1129_p2 = pnand %p688_p4, %p1100_p9  ;;  %s227_s23 = int_to_ptr.vmem [resolvable:$true] %s226_s23 }
  0x21   : > { %s252_s21 = sshll.u32 %s1255_s4, 4  ;;  %s984_s10 = smov [#allocation10]   ;;  %s253_s21 = int_to_ptr.hbm [resolvable:$true] %s252_s21 }
  0x22   : > { %s254_s14 = sshll.u32 %s984_s10, 4  ;;  %s800_s11 = sshra.s32 %s225_s15, 4  ;;  %s801_s11 = int_to_ptr.hbm [resolvable:$true] %s800_s11  ;;  %s255_s14 = int_to_ptr.vmem [resolvable:$true] %s254_s14 }
  0x23   : > { %s802_s19 = scalar_lea.hbm %s801_s11, 8  ;;  %p804_p7 = pneg %p1129_p2 }
  0x24   : > { %p803_p6 = scmp.ne.s32.totalorder %s801_s11, %s802_s19  ;;  %s807_s9 = scalar_lea.hbm %s1252_s1, 16 }
  0x25   : > { %p808_p4 = scmp.lt.s32.totalorder %s801_s11, %s1252_s1  ;;  %p809_p11 = scmp.lt.s32.totalorder %s807_s9, %s802_s19 }
  0x26   : > { %p805_p8 = pnand %p804_p7, %p803_p6 }
  0x27   : > { %p810_p12 = por %p809_p11, %p808_p4 }
  0x28   : > { %p806_p10 = pneg %p805_p8 }
  0x2a   : > { %p811_p0 = pnand %p810_p12, %p806_p10 }
  0x2c   : > { %814 = shalt.err (!%p811_p0)
}
  0x2d   : > { %691 = dma.hbm_to_vmem [thread:$0]  (!%p1129_p2), %s225_s15, 128, %s227_s23, [#allocation6]  }
  0x2e   : > { %s1279_s2 = smov 8   ;;  %s1280_s18 = smov 128  }
  0x2f   : > { %697 = dma.hbm_to_vmem [thread:$0]  (!%p1080_p5), %s253_s21, 512, %s255_s14, [#allocation9], %s1280_s18, %s1280_s18, %s1279_s2  }
  0x30   : > { %273 = sbr.rel (%p1069_p3) target bundleno = 932 (0x3a4), region = 40 }
  0x35   : > { %941 = dma.done.wait (%p1100_p9), [#allocation6], 128  }
  0x36   : > { %943 = vsyncadd (%p1100_p9), [#allocation6], 4294967168 }
  0x37   : > { %945 = dma.done.wait (%p1064_p1), [#allocation9], 1024  }
  0x38   : > { %947 = vsyncadd (%p1064_p1), [#allocation9], 4294966272  ;;  %s1162_s28 = sand.u32 1, %s962_s27   ;;  %v324_v0 = vld [vmem:[#allocation8 + $0x10] sm:$0xff]  ;;  %v325_v1 = vld [vmem:[#allocation8 + $0x18] sm:$0xff]  ;;  %vm332_vm0 = vcmask 261120  }
  0x39   : > { %s658_s30 = sshll.u32 %s1162_s28, 3  ;;  %v322_v2 = vld [vmem:[#allocation8] sm:$0xff]  ;;  %v327_v3 = vpack.c.bf16 %v325_v1, %v324_v0  ;;  %v323_v4 = vld [vmem:[#allocation8 + $0x8] sm:$0xff]  ;;  %v319_v5 = vld [vmem:[#allocation5] sm:$0xff]  ;;  %vm350_vm1 = vcmask 257024   ;;  %p661_p1 = scmp.eq.s32.totalorder %s970_s29, 0 }
  0x3a   : > { %v320_v6 = vmax.f32 %v319_v5, 0.0  ;;  %v326_v7 = vpack.c.bf16 %v323_v4, %v322_v2  ;;  %v764_v9 = vld [vmem:[%s1254_s3] ss:$0 sm:$0xff]  ;;  %s1171_s16 = scalar_lea.vmem [#allocation11], %s658_s30  ;;  %s1173_s17 = scalar_lea.vmem [#allocation12], %s658_s30 }
  0x3b   : > { %342 = vmatpush.bf16.msra.mxu0 %v327_v3 }
  0x3c   : > { %v321_v8 = vpack.c.bf16 %v320_v6, %v320_v6 }
  0x3f   : > { %343 = vmatpush.bf16.msra.mxu0 %v326_v7 }
  0x42   : > { %660 = vmatmul.msk.bf16.vlgmr.msra.gmra.mxu0 %vm332_vm0, %v321_v8 }
  0xbf   : > { %v345_v10 = vpop.f32.mrf.mxu0 }
  0xc0   : > { %v346_v11 = vadd.f32 %v764_v9, %v345_v10 }
  0xc2   : > { %v349_v12 = vpack.c.bf16 %v346_v11, %v346_v11 }
  0xc4   : > { %351 = vst.msk [vmem:[#allocation2] sm:$0xf] %vm350_vm1, %v349_v12 }
  0xc7   : > { %v347_v13 = vpop.f32.mrf.mxu0  ;;  %356 = sbr.rel (%p661_p1) target bundleno = 222 (0xde), region = 60 }
  0xcb   : > { %v1169_v14 = vld [vmem:[#allocation2] sm:$0xf] }
  0xcc   : > { %vm357_vm2 = vcmask 64512   ;;  %v359_v15 = vunpack.c.l.bf16 %v1169_v14  ;;  %v985_v16 = vmov 0.125  }
  0xcd   : > { %358 = vst.msk [vmem:[%s1173_s17] sm:$0xff] %vm357_vm2, %v985_v16 }
  0xce   : > { %v361_v17 = vsel %vm332_vm0, %v359_v15, 0.0 }
  0xcf   : > { %v362_v18 = vrot.slane %v361_v17, 4 }
  0xd1   : > { %v363_v19 = vadd.f32 %v362_v18, %v361_v17 }
  0xd3   : > { %v364_v20 = vrot.slane %v363_v19, 2 }
  0xd5   : > { %v365_v21 = vadd.f32 %v364_v20, %v363_v19 }
  0xd7   : > { %v366_v22 = vrot.slane %v365_v21, 1 }
  0xd9   : > { %v367_v23 = vadd.f32 %v366_v22, %v365_v21 }
  0xdb   : > { %v368_v24 = vmul.f32 0.125, %v367_v23 }
  0xdd   : > { %369 = vst.msk [vmem:[%s1171_s16] sm:$0xff] %vm332_vm0, %v368_v24 }
  0xde PF: > { %p662_p3 = scmp.ne.s32.totalorder %s970_s29, 0 }
  0xdf   : > { %s427_s22 = sld [smem:[#allocation4]] (!%p662_p3) }
  0xe0   : > { %373 = sbr.rel (%p662_p3) target bundleno = 904 (0x388), region = 64 }
  0xe5   : > { %v381_v25 = vld [vmem:[#allocation10 + $0x10] sm:$0xff]  ;;  %v382_v26 = vld [vmem:[#allocation10 + $0x18] sm:$0xff]  ;;  %v379_v27 = vld [vmem:[#allocation10] sm:$0xff]  ;;  %v412_v34 = vsel %vm332_vm0, %v1169_v14, 0  ;;  %v428_v41 = vlaneseq  ;;  %v435_v45 = vstv %s427_s22  ;;  %vm440_vm4 = vcmask 64512  }
  0xe6   : > { %v384_v28 = vpack.c.bf16 %v382_v26, %v381_v25  ;;  %v380_v29 = vld [vmem:[#allocation10 + $0x8] sm:$0xff]  ;;  %v376_v30 = vld [vmem:[#allocation5] sm:$0xff]  ;;  %421 = vmatpush.bf16.xpose.msra.mxu1 %v412_v34  ;;  %v765_v35 = vld [vmem:[%s1256_s5] ss:$0 sm:$0xff]  ;;  %v666_v47 = vxor.u32 2147483648, %v435_v45  ;;  %vm470_vm5 = vcmask 1043456  }
  0xe7   : > { %v377_v31 = vmax.f32 %v376_v30, 0.0  ;;  %v383_v32 = vpack.c.bf16 %v380_v29, %v379_v27  ;;  %v429_v42 = vshrl.u32 %v428_v41, 7  ;;  %v433_v43 = vand.u32 127, %v428_v41 }
  0xe8   : > { %399 = vmatpush.bf16.msra.mxu0 %v384_v28  ;;  %v471_v57 = vsel %vm470_vm5, %v1169_v14, 0 }
  0xe9   : > { %v378_v33 = vpack.c.bf16 %v377_v31, %v377_v31  ;;  %v434_v44 = vsub.s32 %v429_v42, %v433_v43  ;;  %480 = vmatpush.bf16.msra.mxu2 %v471_v57 }
  0xeb   : > { %v665_v46 = vxor.u32 2147483648, %v434_v44 }
  0xec   : > { %400 = vmatpush.bf16.msra.mxu0 %v383_v32 }
  0xed   : > { %vm438_vm3 = vcmp.le.s32.totalorder %v665_v46, %v666_v47 }
  0xef   : > { %663 = vmatmul.msk.bf16.vlgmr.msra.gmra.mxu0 %vm332_vm0, %v378_v33 }
 0x16c   : > { %v402_v36 = vpop.f32.mrf.mxu0 }
 0x16d   : > { %v403_v37 = vadd.f32 %v765_v35, %v402_v36 }
 0x16f   : > { %v406_v38 = vmul.f32 0.17677669, %v403_v37 }
 0x171   : > { %v407_v39 = vpack.c.bf16 %v406_v38, %v406_v38 }
 0x173   : > { %664 = vmatmul.msk.bf16.vlgmr.msra.gmra.mxu1 %vm332_vm0, %v407_v39 }
 0x174   : > { %v404_v40 = vpop.f32.mrf.mxu0 }
 0x1f0   : > { %v423_v48 = vpop.f32.mrf.mxu1 }
 0x1f1   : > { %v439_v49 = vsel %vm438_vm3, %v423_v48, -1e+09 }
 0x1f2   : > { %v441_v50 = vsel %vm440_vm4, %v439_v49, -inf }
 0x1f3   : > { %442 = vmax.xlane.f32.xlu0 %v441_v50 }
 0x1f8   : > { %v425_v51 = vpop.f32.mrf.mxu1 }
 0x266   : > { %v443_v52 = vpop.xlane.xlu0 %442 }
 0x267   : > { %v444_v53 = vsub.f32 %v439_v49, %v443_v52 }
 0x269   : > { %v445_v54 = vmul.f32 1.442695, %v444_v53 }
 0x26b   : > { %766 = vpow2.f32 %v445_v54 }
 0x271   : > { %v767_v55 = vpop.eup %766 }
 0x272   : > { %v447_v56 = vsel %vm440_vm4, %v767_v55, 0.0 }
 0x273   : > { %448 = vadd.xlane.f32.xlu0 %v447_v56 }
 0x2e6   : > { %v449_v58 = vpop.xlane.xlu0 %448 }
 0x2e7   : > { %768 = vrcp.f32 %v449_v58  ;;  %v461_v62 = vand.u32 2147483648, %v449_v58  ;;  %v459_v0 = vand.u32 2147483647, %v449_v58  ;;  %vm455_vm7 = vweird.f32 %v449_v58 }
 0x2e9   : > { %v462_v2 = vor.u32 1.1754944e-38, %v461_v62  ;;  %vm460_vm9 = vcmp.eq.f32.partialorder %v459_v0, 8.507059e+37 }
 0x2ed   : > { %v769_v59 = vpop.eup %768 }
 0x2ee   : > { %v451_v60 = vmul.f32 %v769_v59, %v449_v58  ;;  %vm456_vm6 = vweird.f32 %v769_v59 }
 0x2ef   : > { %vm457_vm8 = vmor %vm455_vm7, %vm456_vm6 }
 0x2f0   : > { %v452_v61 = vsub.f32 1.0, %v451_v60 }
 0x2f2   : > { %v453_v63 = vmul.f32 %v769_v59, %v452_v61 }
 0x2f4   : > { %v454_v1 = vadd.f32 %v769_v59, %v453_v63 }
 0x2f6   : > { %v458_v3 = vsel %vm457_vm8, %v769_v59, %v454_v1 }
 0x2f7   : > { %v463_v4 = vsel %vm460_vm9, %v462_v2, %v458_v3 }
 0x2f8   : > { %v464_v5 = vmul.f32 %v767_v55, %v463_v4 }
 0x2fa   : > { %465 = vst.msk [vmem:[%s1173_s17] sm:$0xff] %vm440_vm4, %v464_v5  ;;  %v466_v6 = vpack.c.bf16 %v464_v5, %v464_v5 }
 0x2fc   : > { %667 = vmatmul.msk.bf16.vlgmr.msra.gmra.mxu2 %vm440_vm4, %v466_v6 }
 0x37f   : > { %v482_v7 = vpop.f32.mrf.mxu2 }
 0x380   : > { %486 = vst.msk [vmem:[%s1171_s16] sm:$0xff] %vm332_vm0, %v482_v7 }
 0x387   : > { %v484_v8 = vpop.f32.mrf.mxu2 }
 0x388 PF: > { %s504_s15 = scalar_lea.hbm %s1257_s6, %s1115_s0  ;;  %s506_s23 = sshll.u32 %s1171_s16, 4  ;;  %s507_s23 = int_to_ptr.vmem [resolvable:$true] %s506_s23 }
 0x389   : > { %s508_s21 = sshll.u32 %s504_s15, 4  ;;  %s488_s10 = scalar_lea.sflag [#allocation7], %s1162_s28  ;;  %s509_s21 = int_to_ptr.hbm [resolvable:$true] %s508_s21 }
 0x38a   : > { %s874_s14 = sshra.s32 %s509_s21, 4  ;;  %s880_s18 = scalar_lea.hbm %s1257_s6, 16  ;;  %s875_s14 = int_to_ptr.hbm [resolvable:$true] %s874_s14 }
 0x38b   : > { %s876_s11 = scalar_lea.hbm %s875_s14, 8  ;;  %p881_p2 = scmp.lt.s32.totalorder %s875_s14, %s1257_s6 }
 0x38c   : > { %p877_p5 = scmp.ne.s32.totalorder %s875_s14, %s876_s11  ;;  %p882_p6 = scmp.lt.s32.totalorder %s880_s18, %s876_s11 }
 0x38e   : > { %p878_p9 = pnand %p877_p5, %p1106_p13  ;;  %p883_p7 = por %p882_p6, %p881_p2 }
 0x390   : > { %p879_p0 = pneg %p878_p9 }
 0x392   : > { %p884_p8 = pnand %p883_p7, %p879_p0 }
 0x394   : > { %887 = shalt.err (!%p884_p8)
}
 0x395   : > { %684 = dma.vmem_to_hbm [thread:$0]  (%p1106_p13), %s507_s23, 128, %s509_s21, %s488_s10  }
 0x396   : > { %s519_s20 = scalar_lea.hbm %s1258_s7, %s1115_s0  ;;  %s521_s29 = sshll.u32 %s1173_s17, 4  ;;  %s522_s29 = int_to_ptr.vmem [resolvable:$true] %s521_s29 }
 0x397   : > { %s523_s22 = sshll.u32 %s519_s20, 4  ;;  %s493_s25 = scalar_lea.sflag [#allocation13], %s1162_s28  ;;  %s524_s22 = int_to_ptr.hbm [resolvable:$true] %s523_s22 }
 0x398   : > { %s902_s9 = sshra.s32 %s524_s22, 4  ;;  %s908_s23 = scalar_lea.hbm %s1258_s7, 16  ;;  %s903_s9 = int_to_ptr.hbm [resolvable:$true] %s902_s9 }
 0x399   : > { %s904_s15 = scalar_lea.hbm %s903_s9, 8  ;;  %p909_p12 = scmp.lt.s32.totalorder %s903_s9, %s1258_s7 }
 0x39a   : > { %p905_p10 = scmp.ne.s32.totalorder %s903_s9, %s904_s15  ;;  %p910_p1 = scmp.lt.s32.totalorder %s908_s23, %s904_s15 }
 0x39c   : > { %p906_p4 = pnand %p905_p10, %p1106_p13  ;;  %p911_p3 = por %p910_p1, %p909_p12 }
 0x39e   : > { %p907_p11 = pneg %p906_p4 }
 0x3a0   : > { %p912_p5 = pnand %p911_p3, %p907_p11 }
 0x3a2   : > { %915 = shalt.err (!%p912_p5)
}
 0x3a3   : > { %685 = dma.vmem_to_hbm [thread:$0]  (%p1106_p13), %s522_s29, 128, %s524_s22, %s493_s25  }
 0x3a4 PF: > { %s1281_s0 = sld [smem:[#allocation21_spill]]  ;;  %p709_p9 = scmp.ge.s32.totalorder %s978_s8, 2 }
 0x3a5   : > { %s535_s28 = sand.u32 1, %s958_s26  }
 0x3a6   : > { %s536_s17 = scalar_lea.sflag [#allocation7], %s535_s28 }
 0x3aa   : > { %p1282_p0 = scmp.ne.s32.totalorder %s1281_s0, 0 }
 0x3ac   : > { %p699_p2 = pnand %p709_p9, %p1282_p0 }
 0x3ae   : > { %p700_p6 = pneg %p699_p2 }
 0x3b0   : > { %949 = dma.done.wait (%p700_p6), %s536_s17, 128  }
 0x3b1   : > { %951 = vsyncadd (%p700_p6), %s536_s17, 4294967168  ;;  %s546_s19 = scalar_lea.sflag [#allocation13], %s535_s28 }
 0x3b2   : > { %953 = dma.done.wait (%p700_p6), %s546_s19, 128  }
 0x3b3   : > { %955 = vsyncadd (%p700_p6), %s546_s19, 4294967168  ;;  %s27_s8 = sadd.s32 1, %s978_s8   ;;  %s1283_s24 = sld [smem:[#allocation18_spill]] }
 0x3b4   : > { %p24_p7 = scmp.ge.s32.totalorder %s27_s8, 4   ;;  %s1284_s28 = sld [smem:[#allocation22_spill]] }
 0x3b5   : > { %s1285_s29 = sld [smem:[#allocation19_spill]]  ;;  %s1287_s26 = smov %s962_s27 }
 0x3b6   : > { %s1286_s30 = sld [smem:[#allocation20_spill]]  ;;  %26 = sbr.rel (!%p24_p7) target bundleno = 11 (0xb), region = 116 }
 0x3b9   : > { %s1288_s27 = smov %s1283_s24 }
 0x3bb   :  { %552 = vsyncpa [#allocation6], 1 }
 0x3bc   :  { %554 = vsyncpa [#allocation6 + $0x1], 1 }
 0x3bd   :  { %555 = vsyncpa [#allocation9], 1 }
 0x3be   :  { %556 = vsyncpa [#allocation7], 1 }
 0x3bf   :  { %558 = vsyncpa [#allocation7 + $0x1], 1 }
 0x3c0   :  { %559 = vsyncpa [#allocation13], 1 }
 0x3c1   :  { %561 = vsyncpa [#allocation13 + $0x1], 1 }

</bundles_post_ra>
